<compile_context>
chip_gen: v6e
topology: v6e:2x2x1
jax: 0.10.0
libtpu: 0.0.40
codegen_flags: <defaults>
</compile_context>

<pallas_src>
import jax
import jax.numpy as jnp
from jax.experimental import pallas as pl
from jax.experimental.pallas import tpu as pltpu


# --------------------------------------------------------------------------
# Kernel
# --------------------------------------------------------------------------
def _make_kernel(apply_mask: bool):
    def kernel(*refs):
        if apply_mask:
            q_ref, v_ref, w_ref, m_ref, pooled_ref, attn_ref = refs
        else:
            q_ref, v_ref, w_ref, pooled_ref, attn_ref = refs
            m_ref = None

        q = q_ref[...]        # (TB, Q)
        v = v_ref[...]        # (TB, S, V)
        w = w_ref[...]        # (Q, V)

        # One MXU-friendly matmul for the whole batch tile: (TB, Q) @ (Q, V).
        qw = jnp.dot(q, w, preferred_element_type=jnp.float32)      # (TB, V)

        # scores[b, s] = sum_v value[b, s, v] * qw[b, v]
        # VPU broadcast-multiply + lane reduce (no M=1 matvecs on the MXU).
        scores = jnp.sum(v * qw[:, None, :], axis=-1)                # (TB, S)

        # Softmax over the sequence axis (one reciprocal per row).
        mx = jnp.max(scores, axis=-1, keepdims=True)                 # (TB, 1)
        e = jnp.exp(scores - mx)                                     # (TB, S)
        attn = e * (1.0 / jnp.sum(e, axis=-1, keepdims=True))        # (TB, S)

        if apply_mask:
            attn = attn * m_ref[...]                                 # (TB, S)
            attn = attn * (1.0 / jnp.sum(attn, axis=-1, keepdims=True))

        # pooled[b, v] = sum_s attn[b, s] * value[b, s, v]
        # VPU broadcast-multiply + sublane reduce over the slab.
        pooled = jnp.sum(attn[:, :, None] * v, axis=1)               # (TB, V)

        pooled_ref[...] = pooled.astype(pooled_ref.dtype)
        attn_ref[...] = attn.astype(attn_ref.dtype)

    return kernel


# --------------------------------------------------------------------------
# Tiling heuristics
# --------------------------------------------------------------------------
def _choose_tb(B, S, V):
    """Batch rows per grid step.

    Target ~3 MiB value tiles (double-buffered -> ~6 MiB), well inside the
    default scoped-VMEM limit on every generation (v5e 16 MiB, v6e 32 MiB,
    v7x 32 MiB of 64 MiB physical).  TB is a multiple of 8 for sublane-aligned
    block shapes, and a multiple of 128/256 when big enough to fill the MXU.
    """
    target_bytes = 3 * 1024 * 1024          # per value buffer
    bytes_per_row = max(1, S * V * 4)
    rows = max(1, target_bytes // bytes_per_row)
    if rows >= B:
        return B                            # whole batch in one tile
    if rows >= 256:
        tb = (rows // 256) * 256            # v6e/v7x 256-wide MXU tiles
    elif rows >= 128:
        tb = 128                            # v5e-native 128-row MXU tile
    else:
        tb = max(8, (rows // 8) * 8)        # sublane-aligned fallback
        # TODO(synk): for extremely large S*V (TB pinned at 8), chunk S inside
        # the kernel with lax.fori_loop(unroll=True) to bound live ranges.
    return min(tb, B)


# --------------------------------------------------------------------------
# pallas_call wrapper
# --------------------------------------------------------------------------
@jax.jit
def _pallas_forward(query, value, weight, mask):
    B, Q = query.shape
    _, S, V = value.shape
    has_mask = mask is not None

    TB = _choose_tb(B, S, V)
    grid = (pl.cdiv(B, TB),)

    in_specs = [
        pl.BlockSpec((TB, Q), lambda b: (b, 0)),        # query slab
        pl.BlockSpec((TB, S, V), lambda b: (b, 0, 0)),  # value slab
        pl.BlockSpec((Q, V), lambda b: (0, 0)),         # weight (grid-invariant)
    ]
    args = [query, value, weight]
    if has_mask:
        in_specs.append(pl.BlockSpec((TB, S), lambda b: (b, 0)))  # mask slab
        args.append(mask)

    flops = 2 * B * Q * V + 4 * B * S * V
    bytes_accessed = 4 * (B * Q + B * S * V + Q * V + B * V + B * S
                          + (B * S if has_mask else 0))
    cost = pl.CostEstimate(flops=flops,
                           transcendentals=B * S,
                           bytes_accessed=bytes_accessed)

    pooled, attn = pl.pallas_call(
        _make_kernel(has_mask),
        out_shape=(
            jax.ShapeDtypeStruct((B, V), jnp.float32),
            jax.ShapeDtypeStruct((B, S), jnp.float32),
        ),
        grid=grid,
        in_specs=in_specs,
        out_specs=(
            pl.BlockSpec((TB, V), lambda b: (b, 0)),    # lane/sublane-dense
            pl.BlockSpec((TB, S), lambda b: (b, 0)),
        ),
        compiler_params=pltpu.CompilerParams(
            dimension_semantics=("parallel",),          # batch tiles shard
        ),                                              # across v7x megacore
        cost_estimate=cost,
    )(*args)

    return pooled, attn


def bilinear_attention(query, value, weight, node_mask=None):
    """Pallas implementation of BilinearAttentionLayer.forward.

    query:     (B, Q) float32
    value:     (B, S, V) float32
    weight:    (Q, V) float32   -- nn.Linear(value_dim, query_dim).weight
    node_mask: optional (B, S) float32
    returns:   (pooled (B, V), attn (B, S))

    Note: like the PyTorch module, an all-zero mask row produces NaN
    (renormalization divides by zero) -- caller precondition.
    """
    return _pallas_forward(query, value, weight, node_mask)


# --------------------------------------------------------------------------
# Pure-JAX reference (matches the PyTorch module exactly)
# --------------------------------------------------------------------------
def _reference(query, value, weight, node_mask=None):
    attn = jnp.einsum("bsv,qv,bq->bs", value, weight, query)
    attn = jax.nn.softmax(attn, axis=1)
    if node_mask is not None:
        attn = attn * node_mask
        attn = attn / jnp.sum(attn, axis=1, keepdims=True)
    pooled = jnp.einsum("bs,bsv->bv", attn, value)
    return pooled, attn


if __name__ == "__main__":
    B, S, Q, V = 2, 8, 32, 16

    key = jax.random.PRNGKey(0)
    kq, kv, kw, km = jax.random.split(key, 4)

    query = jax.random.normal(kq, (B, Q), dtype=jnp.float32)
    value = jax.random.normal(kv, (B, S, V), dtype=jnp.float32)
    # Deterministic "nn.Linear(value_dim, query_dim, bias=False)" weight.
    weight = jax.random.normal(kw, (Q, V), dtype=jnp.float32) * 0.1
    node_mask = (jax.random.uniform(km, (B, S)) > 0.3).astype(jnp.float32)
    # Avoid all-zero mask rows (same precondition as the PyTorch module).
    node_mask = node_mask.at[:, 0].set(1.0)

    # Masked path
    pooled, attn = bilinear_attention(query, value, weight, node_mask)
    pooled = jax.block_until_ready(pooled)
    attn = jax.block_until_ready(attn)

    ref_pooled, ref_attn = _reference(query, value, weight, node_mask)
    assert pooled.shape == (B, V) and attn.shape == (B, S)
    assert jnp.allclose(pooled, ref_pooled, atol=1e-5, rtol=1e-5)
    assert jnp.allclose(attn, ref_attn, atol=1e-5, rtol=1e-5)

    # Unmasked path (separate pallas_call with no mask operand / DMA stream)
    pooled2, attn2 = bilinear_attention(query, value, weight, None)
    pooled2 = jax.block_until_ready(pooled2)
    ref_pooled2, ref_attn2 = _reference(query, value, weight, None)
    assert jnp.allclose(pooled2, ref_pooled2, atol=1e-5, rtol=1e-5)
    assert jnp.allclose(attn2, ref_attn2, atol=1e-5, rtol=1e-5)

    print("KERNEL_OK")
</pallas_src>

<mosaic_0001>
module attributes {stable_mosaic.version = 11 : i64} {
  func.func @kernel(%arg0: i32, %arg1: memref<2x32xf32, #tpu.memory_space<vmem>>, %arg2: memref<2x8x16xf32, #tpu.memory_space<vmem>>, %arg3: memref<32x16xf32, #tpu.memory_space<vmem>>, %arg4: memref<2x8xf32, #tpu.memory_space<vmem>>, %arg5: memref<2x16xf32, #tpu.memory_space<vmem>>, %arg6: memref<2x8xf32, #tpu.memory_space<vmem>>) attributes {dimension_semantics = [#tpu.dimension_semantics<parallel>], iteration_bounds = array<i64: 1>, scalar_prefetch = 0 : i64, scratch_operands = 0 : i64, tpu.core_type = #tpu.core_type<tc>, window_params = [{transform_indices = @transform_0, window_bounds = array<i64: 2, 32>}, {transform_indices = @transform_1, window_bounds = array<i64: 2, 8, 16>}, {pipeline_mode = #tpu.pipeline_mode<synchronous>, transform_indices = @transform_2, window_bounds = array<i64: 32, 16>}, {transform_indices = @transform_3, window_bounds = array<i64: 2, 8>}, {transform_indices = @transform_4, window_bounds = array<i64: 2, 16>}, {transform_indices = @transform_5, window_bounds = array<i64: 2, 8>}]} {
    %c0 = arith.constant 0 : index
    %c0_0 = arith.constant 0 : index
    %0 = vector.load %arg1[%c0, %c0_0] : memref<2x32xf32, #tpu.memory_space<vmem>>, vector<2x32xf32>
    %c0_1 = arith.constant 0 : index
    %c0_2 = arith.constant 0 : index
    %c0_3 = arith.constant 0 : index
    %1 = vector.load %arg2[%c0_1, %c0_2, %c0_3] : memref<2x8x16xf32, #tpu.memory_space<vmem>>, vector<2x8x16xf32>
    %c0_4 = arith.constant 0 : index
    %c0_5 = arith.constant 0 : index
    %2 = vector.load %arg3[%c0_4, %c0_5] : memref<32x16xf32, #tpu.memory_space<vmem>>, vector<32x16xf32>
    %cst = arith.constant dense<0.000000e+00> : vector<2x16xf32>
    %3 = tpu.matmul %0, %2, %cst {dimension_numbers = #tpu.dot_dimension_numbers<[1], [0], [0], [1], [0, 0, 1, 1], [], []>} : vector<2x32xf32>, vector<32x16xf32>, vector<2x16xf32> -> vector<2x16xf32>
    %4 = vector.shape_cast %3 : vector<2x16xf32> to vector<2x1x16xf32>
    %5 = vector.broadcast %4 : vector<2x1x16xf32> to vector<2x8x16xf32>
    %6 = arith.mulf %1, %5 : vector<2x8x16xf32>
    %cst_6 = arith.constant dense<0.000000e+00> : vector<2x8xf32>
    %7 = vector.multi_reduction <add>, %6, %cst_6 [2] : vector<2x8x16xf32> to vector<2x8xf32>
    %cst_7 = arith.constant dense<0xFF800000> : vector<2xf32>
    %8 = vector.multi_reduction <maximumf>, %7, %cst_7 [1] : vector<2x8xf32> to vector<2xf32>
    %9 = vector.shape_cast %8 : vector<2xf32> to vector<2x1xf32>
    %10 = vector.broadcast %9 : vector<2x1xf32> to vector<2x8xf32>
    %11 = arith.subf %7, %10 : vector<2x8xf32>
    %12 = math.exp %11 : vector<2x8xf32>
    %cst_8 = arith.constant dense<0.000000e+00> : vector<2xf32>
    %13 = vector.multi_reduction <add>, %12, %cst_8 [1] : vector<2x8xf32> to vector<2xf32>
    %14 = vector.shape_cast %13 : vector<2xf32> to vector<2x1xf32>
    %cst_9 = arith.constant 1.000000e+00 : f32
    %15 = vector.broadcast %cst_9 : f32 to vector<2x1xf32>
    %16 = arith.divf %15, %14 : vector<2x1xf32>
    %17 = vector.broadcast %16 : vector<2x1xf32> to vector<2x8xf32>
    %18 = arith.mulf %12, %17 : vector<2x8xf32>
    %c0_10 = arith.constant 0 : index
    %c0_11 = arith.constant 0 : index
    %19 = vector.load %arg4[%c0_10, %c0_11] : memref<2x8xf32, #tpu.memory_space<vmem>>, vector<2x8xf32>
    %20 = arith.mulf %18, %19 : vector<2x8xf32>
    %cst_12 = arith.constant dense<0.000000e+00> : vector<2xf32>
    %21 = vector.multi_reduction <add>, %20, %cst_12 [1] : vector<2x8xf32> to vector<2xf32>
    %22 = vector.shape_cast %21 : vector<2xf32> to vector<2x1xf32>
    %cst_13 = arith.constant 1.000000e+00 : f32
    %23 = vector.broadcast %cst_13 : f32 to vector<2x1xf32>
    %24 = arith.divf %23, %22 : vector<2x1xf32>
    %25 = vector.broadcast %24 : vector<2x1xf32> to vector<2x8xf32>
    %26 = arith.mulf %20, %25 : vector<2x8xf32>
    %27 = vector.shape_cast %26 : vector<2x8xf32> to vector<2x8x1xf32>
    %28 = vector.broadcast %27 : vector<2x8x1xf32> to vector<2x8x16xf32>
    %29 = arith.mulf %28, %1 : vector<2x8x16xf32>
    %cst_14 = arith.constant dense<0.000000e+00> : vector<2x16xf32>
    %30 = vector.multi_reduction <add>, %29, %cst_14 [1] : vector<2x8x16xf32> to vector<2x16xf32>
    %c0_15 = arith.constant 0 : index
    %c0_16 = arith.constant 0 : index
    %31 = vector.load %arg5[%c0_15, %c0_16] : memref<2x16xf32, #tpu.memory_space<vmem>>, vector<2x16xf32>
    tpu.vector_store %arg5[%c0_15, %c0_16], %30 {strides = array<i32>} : memref<2x16xf32, #tpu.memory_space<vmem>>, vector<2x16xf32>,
    %c0_17 = arith.constant 0 : index
    %c0_18 = arith.constant 0 : index
    %32 = vector.load %arg6[%c0_17, %c0_18] : memref<2x8xf32, #tpu.memory_space<vmem>>, vector<2x8xf32>
    tpu.vector_store %arg6[%c0_17, %c0_18], %26 {strides = array<i32>} : memref<2x8xf32, #tpu.memory_space<vmem>>, vector<2x8xf32>,
    return
  }
  func.func @transform_0(%arg0: i32) -> (i32, i32) {
    %c0_i32 = arith.constant 0 : i32
    %c0_i32_0 = arith.constant 0 : i32
    return %arg0, %c0_i32 : i32, i32
  }
  func.func @transform_1(%arg0: i32) -> (i32, i32, i32) {
    %c0_i32 = arith.constant 0 : i32
    %c0_i32_0 = arith.constant 0 : i32
    %c0_i32_1 = arith.constant 0 : i32
    return %arg0, %c0_i32, %c0_i32_0 : i32, i32, i32
  }
  func.func @transform_2(%arg0: i32) -> (i32, i32) {
    %c0_i32 = arith.constant 0 : i32
    %c0_i32_0 = arith.constant 0 : i32
    %c0_i32_1 = arith.constant 0 : i32
    return %c0_i32, %c0_i32_0 : i32, i32
  }
  func.func @transform_3(%arg0: i32) -> (i32, i32) {
    %c0_i32 = arith.constant 0 : i32
    %c0_i32_0 = arith.constant 0 : i32
    return %arg0, %c0_i32 : i32, i32
  }
  func.func @transform_4(%arg0: i32) -> (i32, i32) {
    %c0_i32 = arith.constant 0 : i32
    %c0_i32_0 = arith.constant 0 : i32
    return %arg0, %c0_i32 : i32, i32
  }
  func.func @transform_5(%arg0: i32) -> (i32, i32) {
    %c0_i32 = arith.constant 0 : i32
    %c0_i32_0 = arith.constant 0 : i32
    return %arg0, %c0_i32 : i32, i32
  }
}

</mosaic_0001>

<bundles_post_ra>
// kernel: _pallas_forward.1
= control target key start
LH: loop header
LB: loop body
LE: loop exit
PB: predicated region body
PF: predicated region fallthrough
CT: control target
= control target key end

     0   :  { %11 = vsyncpa [#allocation3], 0  ;;  %v420_v1 = vmov 0.0   ;;  %vm421_vm0 = vmmov 0   ;;  %s525_s0 = inlined_call_operand.vmem [shape: f32[2,32], index: 0, kind: input, shape index: {}]   ;;  %s526_s1 = inlined_call_operand.vmem [shape: f32[2,8,16], index: 1, kind: input, shape index: {}]   ;;  %s527_s2 = inlined_call_operand.vmem [shape: f32[32,16], index: 2, kind: input, shape index: {}]   ;;  %s528_s3 = inlined_call_operand.vmem [shape: f32[2,8], index: 3, kind: input, shape index: {}]   ;;  %s529_s4 = inlined_call_operand.hbm [shape: f32[2,16], index: 4, kind: output, shape index: {0}]   ;;  %s530_s5 = inlined_call_operand.hbm [shape: f32[2,8], index: 5, kind: output, shape index: {1}]  }
   0x1   :  { %v27_v0 = vld [vmem:[%s527_s2 + $0x18] sm:$0xff]  ;;  %349 = vmatprep.subr.mxu0 %v420_v1  ;;  %v26_v2 = vld [vmem:[%s527_s2 + $0x10] sm:$0xff]  ;;  %357 = vmatprep.mubr.msk.f32.mxu0 %vm421_vm0, %v420_v1 }
   0x2   :  { %12 = vsyncpa [#allocation5], 0  ;;  %350 = vmatpush3.msra.mxu0 %v27_v0  ;;  %v25_v3 = vld [vmem:[%s527_s2 + $0x8] sm:$0xff]  ;;  %v24_v4 = vld [vmem:[%s527_s2] sm:$0xff]  ;;  %vm28_vm1 = vcmask 261120   ;;  %v106_v8 = vlaneseq  ;;  %vm137_vm2 = vcmask 130048  }
   0x3   :  { %351 = vmatprep.subr.mxu0 %v420_v1  ;;  %v21_v5 = vld [vmem:[%s525_s0] sm:$0x3]  ;;  %v422_v6 = vmov 1966171168   ;;  %v482_v21 = vld [vmem:[%s526_s1 + $0x8] sm:$0xff]  ;;  %vm156_vm3 = vcmask 1041409  }
   0x4   :  { %352 = vmatpush3.msra.mxu0 %v26_v2  ;;  %v104_v7 = vunpack.c.l.s4 %v422_v6  ;;  %v107_v10 = vshrl.u32 %v106_v8, 7  ;;  %v476_v18 = vld [vmem:[%s526_s1] sm:$0xff]  ;;  %v147_v27 = vand.u32 127, %v106_v8  ;;  %vm159_vm4 = vcmask 58368  }
   0x5   :  { %353 = vmatprep.subr.mxu0 %v420_v1  ;;  %v423_v35 = vmov 0   ;;  %v216_v46 = vld [vmem:[%s528_s3] sm:$0x3]  ;;  %s424_s3 = smov [#allocation4]  }
   0x6   :  { %354 = vmatpush3.msra.mxu0 %v25_v3  ;;  %v105_v9 = vunpack.c.0.s8 %v104_v7  ;;  %v471_v14 = vsub.s32 0, %v107_v10  ;;  %v489_v29 = vsub.s32 %v147_v27, %v107_v10  ;;  %367 = vset.pattern.permute.xlu0 %v423_v35  ;;  %v170_v36 = vsub.s32 1, %v107_v10  ;;  %s331_s6 = sshll.u32 %s424_s3, 4  ;;  %s332_s6 = int_to_ptr.vmem [resolvable:$true] %s331_s6 }
   0x7   :  { %355 = vmatprep.subr.mxu0 %v420_v1  ;;  %366 = vset.pattern.permute.xlu1 %v423_v35  ;;  %s376_s7 = scalar_lea.vmem %s332_s6, 32  ;;  %p381_p1 = scmp.lt.s32.totalorder %s332_s6, %s332_s6 }
   0x8   :  { %356 = vmatpush3.msra.mxu0 %v24_v4  ;;  %v108_v11 = vsub.s32 %v105_v9, %v107_v10  ;;  %v221_v47 = vrot.slane %v216_v46, %v471_v14  ;;  %v228_v48 = vrot.slane %v216_v46, %v170_v36  ;;  %p377_p0 = scmp.ne.s32.totalorder %s332_s6, %s376_s7  ;;  %p382_p2 = scmp.lt.s32.totalorder %s376_s7, %s376_s7 }
   0x9   :  { %358 = vmatmul.mubr.msk.f32.vlgmr.msra.gmra.mxu0 %vm28_vm1, %v21_v5 }
   0xa   :  { %p383_p3 = por %p382_p2, %p381_p1 }
   0xc   :  { %p384_p4 = pnand %p383_p3, %p377_p0 }
  0xc9   :  { %v98_v12 = vpop.f32.mrf.mxu0 }
  0xca   :  { %v109_v13 = vrot.slane %v98_v12, %v108_v11 }
  0xcb   :  { %v359_v15 = vpop.f32.mrf.mxu0 }
  0xcc   :  { %v110_v16 = vcombine.high %v109_v13, %v109_v13  ;;  %v117_v17 = vrot.slane %v109_v13, %v108_v11 }
  0xce   :  { %v124_v19 = vrot.slane %v110_v16, %v108_v11  ;;  %v128_v20 = vrot.slane %v117_v17, %v471_v14 }
  0xd0   :  { %v135_v22 = vmul.f32 %v128_v20, %v476_v18  ;;  %v132_v23 = vrot.slane %v124_v19, %v471_v14 }
  0xd2   :  { %v138_v24 = vsel %vm137_vm2, %v135_v22, 0.0  ;;  %v136_v25 = vmul.f32 %v132_v23, %v482_v21 }
  0xd3   :  { %139 = vadd.xlane.f32.xlu0 %v138_v24 }
  0xd4   :  { %v141_v26 = vsel %vm137_vm2, %v136_v25, 0.0 }
  0xd7   :  { %142 = vadd.xlane.f32.xlu0 %v141_v26 }
 0x15c   :  { %v140_v28 = vpop.xlane.xlu0 %139 }
 0x15d   :  { %v151_v31 = vrot.slane %v140_v28, %v489_v29 }
 0x160   :  { %v143_v30 = vpop.xlane.xlu0 %142 }
 0x161   :  { %v155_v32 = vrot.slane %v143_v30, %v489_v29 }
 0x163   :  { %v157_v33 = vsel %vm156_vm3, %v155_v32, %v151_v31 }
 0x164   :  { %v160_v34 = vsel %vm159_vm4, %v157_v33, -inf }
 0x165   :  { %161 = vmax.xlane.f32.xlu1 %v160_v34 }
 0x1ee   :  { %v162_v37 = vpop.xlane.xlu1 %161 }
 0x1ef   :  { %v167_v38 = vrot.slane %v162_v37, %v471_v14  ;;  %v171_v39 = vrot.slane %v162_v37, %v170_v36 }
 0x1f1   :  { %v174_v40 = vsub.f32 %v140_v28, %v167_v38  ;;  %v175_v41 = vsub.f32 %v143_v30, %v171_v39 }
 0x1f3   :  { %v176_v42 = vmul.f32 1.442695, %v174_v40  ;;  %v178_v43 = vmul.f32 1.442695, %v175_v41 }
 0x1f5   :  { %368 = vpow2.f32 %v176_v42 }
 0x1f6   :  { %370 = vpow2.f32 %v178_v43 }
 0x202   :  { %v369_v44 = vpop.eup %368 }
 0x203   :  { %v371_v45 = vpop.eup %370  ;;  %183 = vperm.xlu1 %366, %v369_v44  }
 0x204   :  { %186 = vperm.xlu0 %367, %v371_v45  }
 0x208   :  { %223 = vbcast.lane.b32.xlu0 %v221_v47, 256 }
 0x20c   :  { %230 = vbcast.lane.b32.xlu0 %v228_v48, 256 }
 0x27e   :  { %v184_v49 = vpop.permute.xlu1 %183 }
 0x27f   :  { %v187_v50 = vpop.permute.xlu0 %186  ;;  %v191_v51 = vrot.slane %v184_v49, %v489_v29 }
 0x280   :  { %v195_v52 = vrot.slane %v187_v50, %v489_v29 }
 0x282   :  { %v196_v53 = vsel %vm156_vm3, %v195_v52, %v191_v51 }
 0x283   :  { %v198_v54 = vsel %vm159_vm4, %v196_v53, 0.0  ;;  %v224_v56 = vpop.permute.xlu0 %223 }
 0x284   :  { %199 = vadd.xlane.f32.xlu1 %v198_v54 }
 0x287   :  { %v231_v60 = vpop.permute.xlu0 %230 }
 0x30d   :  { %v200_v55 = vpop.xlane.xlu1 %199 }
 0x30e   :  { %372 = vrcp.f32 %v200_v55 }
 0x31b   :  { %v373_v57 = vpop.eup %372 }
 0x31c   :  { %v207_v58 = vrot.slane %v373_v57, %v471_v14  ;;  %v211_v59 = vrot.slane %v373_v57, %v170_v36 }
 0x31e   :  { %v214_v61 = vmul.f32 %v369_v44, %v207_v58  ;;  %v215_v62 = vmul.f32 %v371_v45, %v211_v59 }
 0x320   :  { %v234_v63 = vmul.f32 %v224_v56, %v214_v61  ;;  %v235_v0 = vmul.f32 %v231_v60, %v215_v62 }
 0x322   :  { %242 = vperm.xlu0 %367, %v235_v0   ;;  %239 = vperm.xlu1 %366, %v234_v63  }
 0x39d   :  { %v243_v1 = vpop.permute.xlu0 %242  ;;  %v240_v2 = vpop.permute.xlu1 %239 }
 0x39e   :  { %v251_v3 = vrot.slane %v243_v1, %v489_v29  ;;  %v247_v4 = vrot.slane %v240_v2, %v489_v29 }
 0x3a0   :  { %v252_v5 = vsel %vm156_vm3, %v251_v3, %v247_v4 }
 0x3a1   :  { %v254_v6 = vsel %vm159_vm4, %v252_v5, 0.0 }
 0x3a2   :  { %255 = vadd.xlane.f32.xlu0 %v254_v6 }
 0x42b   :  { %v256_v7 = vpop.xlane.xlu0 %255 }
 0x42c   :  { %374 = vrcp.f32 %v256_v7 }
 0x439   :  { %v375_v8 = vpop.eup %374 }
 0x43a   :  { %v263_v9 = vrot.slane %v375_v8, %v471_v14  ;;  %v267_v11 = vrot.slane %v375_v8, %v170_v36 }
 0x43c   :  { %v270_v10 = vmul.f32 %v263_v9, %v234_v63  ;;  %v271_v12 = vmul.f32 %v267_v11, %v235_v0 }
 0x43e   :  { %274 = vperm.xlu1 %366, %v270_v10  }
 0x442   :  { %279 = vperm.xlu1 %366, %v271_v12  }
 0x4b9   :  { %v275_v13 = vpop.permute.xlu1 %274 }
 0x4ba   :  { %v282_v15 = vmul.f32 %v275_v13, %v476_v18  ;;  %v307_v20 = vrot.slane %v275_v13, %v489_v29 }
 0x4bc   :  { %v284_v16 = vsel %vm137_vm2, %v282_v15, 0.0 }
 0x4bd   :  { %v285_v17 = vrot.slane %v284_v16, 4  ;;  %v280_v19 = vpop.permute.xlu1 %279 }
 0x4be   :  { %v283_v22 = vmul.f32 %v280_v19, %v482_v21  ;;  %v311_v14 = vrot.slane %v280_v19, %v489_v29 }
 0x4bf   :  { %v286_v23 = vadd.f32 %v285_v17, %v284_v16 }
 0x4c0   :  { %v291_v24 = vsel %vm137_vm2, %v283_v22, 0.0  ;;  %v312_v25 = vsel %vm156_vm3, %v311_v14, %v307_v20 }
 0x4c1   :  { %v287_v26 = vrot.slane %v286_v23, 2  ;;  %v292_v18 = vrot.slane %v291_v24, 4  ;;  %314 = vst.msk [vmem:[#allocation4] sm:$0x3] %vm159_vm4, %v312_v25 }
 0x4c2   :  { %387 = shalt.err (!%p384_p4)
}
 0x4c3   :  { %334 = dma.vmem_to_hbm [thread:$0]  %s332_s6, 32, %s530_s5, [#allocation5]   ;;  %v288_v21 = vadd.f32 %v287_v26, %v286_v23  ;;  %v293_v27 = vadd.f32 %v292_v18, %v291_v24  ;;  %vm302_vm5 = vcmask 123904  }
 0x4c4   :  { %s425_s10 = smov [#allocation2]  }
 0x4c5   :  { %v294_v28 = vrot.slane %v293_v27, 2  ;;  %v289_v30 = vrot.slane %v288_v21, 1  ;;  %s321_s11 = sshll.u32 %s425_s10, 4  ;;  %s322_s11 = int_to_ptr.vmem [resolvable:$true] %s321_s11 }
 0x4c6   :  { %s396_s12 = scalar_lea.vmem %s322_s11, 32  ;;  %p401_p6 = scmp.lt.s32.totalorder %s322_s11, %s322_s11 }
 0x4c7   :  { %v295_v29 = vadd.f32 %v294_v28, %v293_v27  ;;  %v290_v32 = vadd.f32 %v289_v30, %v288_v21  ;;  %p397_p5 = scmp.ne.s32.totalorder %s322_s11, %s396_s12  ;;  %p402_p7 = scmp.lt.s32.totalorder %s396_s12, %s396_s12 }
 0x4c9   :  { %v296_v31 = vrot.slane %v295_v29, 1  ;;  %p403_p8 = por %p402_p7, %p401_p6 }
 0x4cb   :  { %v297_v33 = vadd.f32 %v296_v31, %v295_v29  ;;  %p404_p9 = pnand %p403_p8, %p397_p5 }
 0x4cd   :  { %v300_v34 = vsel %vm156_vm3, %v297_v33, %v290_v32 }
 0x4ce   :  { %303 = vst.msk [vmem:[#allocation2] sm:$0x3] %vm302_vm5, %v300_v34 }
 0x4cf   :  { %407 = shalt.err (!%p404_p9)
}
 0x4d0   :  { %324 = dma.vmem_to_hbm [thread:$0]  %s322_s11, 32, %s529_s4, [#allocation3]  }
 0x4d1   :  { %416 = dma.done.wait [#allocation3], 32  }
 0x4d2   :  { %417 = vsyncadd [#allocation3], 4294967264 }
 0x4d3   :  { %418 = dma.done.wait [#allocation5], 32  }
 0x4d4   :  { %419 = vsyncadd [#allocation5], 4294967264 }
 0x4d5   :  { %341 = vsyncpa [#allocation3], 1 }
 0x4d6   :  { %342 = vsyncpa [#allocation5], 1 }

</bundles_post_ra>
